<compile_context>
chip_gen: v5e
topology: v5e:2x2
jax: 0.10.0
libtpu: 0.0.40
codegen_flags: <defaults>
</compile_context>

<pallas_src>
import functools

import jax
import jax.numpy as jnp
from jax.experimental import pallas as pl
from jax.experimental.pallas import tpu as pltpu

IN_FEATURES = 384    # Config.cfg.model.backbone != 'resnet'
OUT_FEATURES = 5
OUT_PAD = 8          # output padded to 8 lanes; block last dim == full array dim


def _round_up(x: int, m: int) -> int:
    return ((x + m - 1) // m) * m


def _linear_kernel(x_ref, w_ref, b_ref, o_ref):
    # x_ref: (TB, IN) f32   w_ref: (IN, OUT_PAD) f32
    # b_ref: (1, OUT_PAD) f32   o_ref: (TB, OUT_PAD) f32
    # Cast to bf16 *inside* the kernel (no extra HBM pass in the wrapper);
    # MXU accumulates in f32, bias add in f32.
    x = x_ref[...].astype(jnp.bfloat16)
    w = w_ref[...].astype(jnp.bfloat16)
    acc = jnp.dot(x, w, preferred_element_type=jnp.float32)
    o_ref[...] = acc + b_ref[...]


@functools.partial(jax.jit, static_argnames=("tile_b",))
def classifier_forward(x, w, b, *, tile_b: int = 4096):
    """Forward pass of `Classifier`.

    x: (B, IN_FEATURES) f32
    w: (OUT_FEATURES, IN_FEATURES) f32   (PyTorch nn.Linear weight layout)
    b: (OUT_FEATURES,) f32
    returns (B, OUT_FEATURES) f32
    """
    B, in_features = x.shape
    out_features = w.shape[0]

    # Tiny, one-time pads of the *parameters* only (never the activations).
    w_t = jnp.pad(w.T, ((0, 0), (0, OUT_PAD - out_features))).astype(jnp.float32)
    b_p = jnp.pad(b, (0, OUT_PAD - out_features)).astype(jnp.float32).reshape(1, OUT_PAD)

    # Tile selection:
    #  * B <= 16: single block with block dims == full array dims (always legal,
    #    no padding, no masking).
    #  * B  > 16: >= 2 grid steps so the "parallel" batch axis can shard across
    #    v7x's two TensorCores; tb is a multiple of 8 sublanes, capped by tile_b
    #    so the double-buffered f32 x tile fits every generation's scoped VMEM
    #    (tb=4096 -> 2 * 4096 * 1536 B ~= 12.6 MiB < 16 MiB v5e default).
    if B <= 16:
        tb = B
    else:
        tb = min(tile_b, _round_up(pl.cdiv(B, 2), 8))
    grid = (pl.cdiv(B, tb),)   # ragged last tile handled by Pallas masked DMA

    bytes_accessed = (
        B * in_features * 4          # x (f32, read once)
        + in_features * OUT_PAD * 4  # w (f32, resident)
        + OUT_PAD * 4                # bias
        + B * OUT_PAD * 4            # out (narrow f32 writeback)
    )
    cost = pl.CostEstimate(
        flops=2 * B * in_features * OUT_PAD,
        transcendentals=0,
        bytes_accessed=bytes_accessed,
    )

    out_padded = pl.pallas_call(
        _linear_kernel,
        out_shape=jax.ShapeDtypeStruct((B, OUT_PAD), jnp.float32),
        grid_spec=pltpu.PrefetchScalarGridSpec(
            num_scalar_prefetch=0,
            grid=grid,
            in_specs=[
                pl.BlockSpec((tb, in_features), lambda i: (i, 0)),   # x streams
                pl.BlockSpec((in_features, OUT_PAD), lambda i: (0, 0)),  # w resident
                pl.BlockSpec((1, OUT_PAD), lambda i: (0, 0)),            # bias resident
            ],
            out_specs=pl.BlockSpec((tb, OUT_PAD), lambda i: (i, 0)),
        ),
        compiler_params=pltpu.CompilerParams(
            dimension_semantics=("parallel",),
            vmem_limit_bytes=32 * 1024 * 1024,   # safe on v5e/v6e (128 MiB) and v7x (64 MiB)
        ),
        cost_estimate=cost,
    )(x, w_t, b_p)

    # Drop the 3 zero-padded lanes (tiny: 32 B/row read).
    return out_padded[:, :out_features]


if __name__ == "__main__":
    key = jax.random.PRNGKey(0)
    kx, kw, kb = jax.random.split(key, 3)

    batch = 2
    x = jax.random.normal(kx, (batch, IN_FEATURES), dtype=jnp.float32)

    # Deterministic parameter init mimicking nn.Linear default
    # (uniform +/- 1/sqrt(fan_in)); weight kept in PyTorch (OUT, IN) layout.
    bound = 1.0 / jnp.sqrt(jnp.float32(IN_FEATURES))
    w = jax.random.uniform(kw, (OUT_FEATURES, IN_FEATURES),
                           minval=-bound, maxval=bound, dtype=jnp.float32)
    b = jax.random.uniform(kb, (OUT_FEATURES,),
                           minval=-bound, maxval=bound, dtype=jnp.float32)

    out = classifier_forward(x, w, b)
    out = jax.block_until_ready(out)

    # Correctness check against the plain f32 JAX reference (tolerance loosened
    # because the kernel uses bf16 MXU operands with f32 accumulation).
    ref = x @ w.T + b
    assert out.shape == (batch, OUT_FEATURES)
    assert jnp.allclose(out, ref, atol=3e-2, rtol=3e-2), (
        f"max abs err {jnp.max(jnp.abs(out - ref))}"
    )

    print("KERNEL_OK")
</pallas_src>

<mosaic_0001>
module attributes {stable_mosaic.version = 11 : i64} {
  func.func @_linear_kernel(%arg0: i32, %arg1: memref<2x384xf32, #tpu.memory_space<vmem>>, %arg2: memref<384x8xf32, #tpu.memory_space<vmem>>, %arg3: memref<1x8xf32, #tpu.memory_space<vmem>>, %arg4: memref<2x8xf32, #tpu.memory_space<vmem>>) attributes {dimension_semantics = [#tpu.dimension_semantics<parallel>], iteration_bounds = array<i64: 1>, scalar_prefetch = 0 : i64, scratch_operands = 0 : i64, tpu.core_type = #tpu.core_type<tc>, window_params = [{transform_indices = @transform_0, window_bounds = array<i64: 2, 384>}, {pipeline_mode = #tpu.pipeline_mode<synchronous>, transform_indices = @transform_1, window_bounds = array<i64: 384, 8>}, {pipeline_mode = #tpu.pipeline_mode<synchronous>, transform_indices = @transform_2, window_bounds = array<i64: 1, 8>}, {transform_indices = @transform_3, window_bounds = array<i64: 2, 8>}]} {
    %c0 = arith.constant 0 : index
    %c0_0 = arith.constant 0 : index
    %0 = vector.load %arg1[%c0, %c0_0] : memref<2x384xf32, #tpu.memory_space<vmem>>, vector<2x384xf32>
    %1 = arith.truncf %0 : vector<2x384xf32> to vector<2x384xbf16>
    %c0_1 = arith.constant 0 : index
    %c0_2 = arith.constant 0 : index
    %2 = vector.load %arg2[%c0_1, %c0_2] : memref<384x8xf32, #tpu.memory_space<vmem>>, vector<384x8xf32>
    %3 = arith.truncf %2 : vector<384x8xf32> to vector<384x8xbf16>
    %cst = arith.constant dense<0.000000e+00> : vector<2x8xf32>
    %4 = tpu.matmul %1, %3, %cst {dimension_numbers = #tpu.dot_dimension_numbers<[1], [0], [0], [1], [0, 0, 1, 1], [], []>} : vector<2x384xbf16>, vector<384x8xbf16>, vector<2x8xf32> -> vector<2x8xf32>
    %c0_3 = arith.constant 0 : index
    %c0_4 = arith.constant 0 : index
    %5 = vector.load %arg3[%c0_3, %c0_4] : memref<1x8xf32, #tpu.memory_space<vmem>>, vector<1x8xf32>
    %6 = vector.broadcast %5 : vector<1x8xf32> to vector<2x8xf32>
    %7 = arith.addf %4, %6 : vector<2x8xf32>
    %c0_5 = arith.constant 0 : index
    %c0_6 = arith.constant 0 : index
    %8 = vector.load %arg4[%c0_5, %c0_6] : memref<2x8xf32, #tpu.memory_space<vmem>>, vector<2x8xf32>
    tpu.vector_store %arg4[%c0_5, %c0_6], %7 {strides = array<i32>} : memref<2x8xf32, #tpu.memory_space<vmem>>, vector<2x8xf32>,
    return
  }
  func.func @transform_0(%arg0: i32) -> (i32, i32) {
    %c0_i32 = arith.constant 0 : i32
    %c0_i32_0 = arith.constant 0 : i32
    return %arg0, %c0_i32 : i32, i32
  }
  func.func @transform_1(%arg0: i32) -> (i32, i32) {
    %c0_i32 = arith.constant 0 : i32
    %c0_i32_0 = arith.constant 0 : i32
    %c0_i32_1 = arith.constant 0 : i32
    return %c0_i32, %c0_i32_0 : i32, i32
  }
  func.func @transform_2(%arg0: i32) -> (i32, i32) {
    %c0_i32 = arith.constant 0 : i32
    %c0_i32_0 = arith.constant 0 : i32
    %c0_i32_1 = arith.constant 0 : i32
    return %c0_i32, %c0_i32_0 : i32, i32
  }
  func.func @transform_3(%arg0: i32) -> (i32, i32) {
    %c0_i32 = arith.constant 0 : i32
    %c0_i32_0 = arith.constant 0 : i32
    return %arg0, %c0_i32 : i32, i32
  }
}

</mosaic_0001>

<bundles_post_ra>
// kernel: classifier_forward.1
= control target key start
LH: loop header
LB: loop body
LE: loop exit
PB: predicated region body
PF: predicated region fallthrough
CT: control target
= control target key end

     0   :  { %s362_s0 = inlined_call_operand.vmem [shape: f32[2,384], index: 0, kind: input, shape index: {}]   ;;  %s363_s1 = inlined_call_operand.vmem [shape: f32[384,8], index: 1, kind: input, shape index: {}]   ;;  %s364_s2 = inlined_call_operand.vmem [shape: f32[1,8], index: 2, kind: input, shape index: {}]   ;;  %s365_s3 = inlined_call_operand.hbm [shape: f32[2,8], index: 3, kind: output, shape index: {}]  }
   0x1   :  { %v41_v0 = vld [vmem:[%s363_s1 + $0x70] sm:$0xff]  ;;  %v42_v1 = vld [vmem:[%s363_s1 + $0x78] sm:$0xff]  ;;  %v39_v9 = vld [vmem:[%s363_s1 + $0x60] sm:$0xff] }
   0x2   :  { %v57_v2 = vld [vmem:[%s363_s1 + $0xf0] sm:$0xff]  ;;  %v82_v3 = vpack.c.bf16 %v42_v1, %v41_v0  ;;  %v58_v4 = vld [vmem:[%s363_s1 + $0xf8] sm:$0xff]  ;;  %v40_v10 = vld [vmem:[%s363_s1 + $0x68] sm:$0xff] }
   0x3   :  { %v73_v5 = vld [vmem:[%s363_s1 + $0x170] sm:$0xff]  ;;  %v74_v6 = vld [vmem:[%s363_s1 + $0x178] sm:$0xff]  ;;  %v90_v7 = vpack.c.bf16 %v58_v4, %v57_v2  ;;  %v55_v11 = vld [vmem:[%s363_s1 + $0xe0] sm:$0xff]  ;;  %v81_v12 = vpack.c.bf16 %v40_v10, %v39_v9 }
   0x4   :  { %v98_v8 = vpack.c.bf16 %v74_v6, %v73_v5  ;;  %103 = vmatpush.bf16.msra.mxu0 %v82_v3  ;;  %v56_v13 = vld [vmem:[%s363_s1 + $0xe8] sm:$0xff]  ;;  %v71_v14 = vld [vmem:[%s363_s1 + $0x160] sm:$0xff]  ;;  %v37_v18 = vld [vmem:[%s363_s1 + $0x50] sm:$0xff] }
   0x5   :  { %v72_v15 = vld [vmem:[%s363_s1 + $0x168] sm:$0xff]  ;;  %116 = vmatpush.bf16.msra.mxu1 %v90_v7  ;;  %v89_v16 = vpack.c.bf16 %v56_v13, %v55_v11  ;;  %v38_v19 = vld [vmem:[%s363_s1 + $0x58] sm:$0xff]  ;;  %v53_v20 = vld [vmem:[%s363_s1 + $0xd0] sm:$0xff] }
   0x6   :  { %129 = vmatpush.bf16.msra.mxu2 %v98_v8  ;;  %v97_v17 = vpack.c.bf16 %v72_v15, %v71_v14  ;;  %v54_v21 = vld [vmem:[%s363_s1 + $0xd8] sm:$0xff]  ;;  %v69_v22 = vld [vmem:[%s363_s1 + $0x150] sm:$0xff]  ;;  %v80_v24 = vpack.c.bf16 %v38_v19, %v37_v18  ;;  %v35_v27 = vld [vmem:[%s363_s1 + $0x40] sm:$0xff] }
   0x7   :  { %v70_v23 = vld [vmem:[%s363_s1 + $0x158] sm:$0xff]  ;;  %v88_v25 = vpack.c.bf16 %v54_v21, %v53_v20  ;;  %v36_v28 = vld [vmem:[%s363_s1 + $0x48] sm:$0xff]  ;;  %v51_v29 = vld [vmem:[%s363_s1 + $0xc0] sm:$0xff] }
   0x8   :  { %104 = vmatpush.bf16.msra.mxu0 %v81_v12  ;;  %v96_v26 = vpack.c.bf16 %v70_v23, %v69_v22  ;;  %v52_v30 = vld [vmem:[%s363_s1 + $0xc8] sm:$0xff]  ;;  %v67_v31 = vld [vmem:[%s363_s1 + $0x140] sm:$0xff]  ;;  %v79_v33 = vpack.c.bf16 %v36_v28, %v35_v27  ;;  %v33_v36 = vld [vmem:[%s363_s1 + $0x30] sm:$0xff] }
   0x9   :  { %117 = vmatpush.bf16.msra.mxu1 %v89_v16  ;;  %v68_v32 = vld [vmem:[%s363_s1 + $0x148] sm:$0xff]  ;;  %v87_v34 = vpack.c.bf16 %v52_v30, %v51_v29  ;;  %v34_v37 = vld [vmem:[%s363_s1 + $0x38] sm:$0xff]  ;;  %v49_v38 = vld [vmem:[%s363_s1 + $0xb0] sm:$0xff] }
   0xa   :  { %130 = vmatpush.bf16.msra.mxu2 %v97_v17  ;;  %v95_v35 = vpack.c.bf16 %v68_v32, %v67_v31  ;;  %v50_v39 = vld [vmem:[%s363_s1 + $0xb8] sm:$0xff]  ;;  %v65_v40 = vld [vmem:[%s363_s1 + $0x130] sm:$0xff]  ;;  %v78_v42 = vpack.c.bf16 %v34_v37, %v33_v36  ;;  %v31_v43 = vld [vmem:[%s363_s1 + $0x20] sm:$0xff] }
   0xb   :  { %v66_v41 = vld [vmem:[%s363_s1 + $0x138] sm:$0xff]  ;;  %v32_v44 = vld [vmem:[%s363_s1 + $0x28] sm:$0xff]  ;;  %v47_v45 = vld [vmem:[%s363_s1 + $0xa0] sm:$0xff]  ;;  %v86_v46 = vpack.c.bf16 %v50_v39, %v49_v38 }
   0xc   :  { %105 = vmatpush.bf16.msra.mxu0 %v80_v24  ;;  %v94_v47 = vpack.c.bf16 %v66_v41, %v65_v40  ;;  %v48_v48 = vld [vmem:[%s363_s1 + $0xa8] sm:$0xff]  ;;  %v15_v49 = vld [vmem:[%s362_s0] sm:$0x3f] }
   0xd   :  { %118 = vmatpush.bf16.msra.mxu1 %v88_v25  ;;  %v63_v50 = vld [vmem:[%s363_s1 + $0x120] sm:$0xff]  ;;  %v64_v51 = vld [vmem:[%s363_s1 + $0x128] sm:$0xff]  ;;  %17 = vst [vmem:[#allocation1] ss:$4 sm:$0xff] %v15_v49 }
   0xe   :  { %131 = vmatpush.bf16.msra.mxu2 %v96_v26 }
  0x10   :  { %106 = vmatpush.bf16.msra.mxu0 %v79_v33 }
  0x11   :  { %119 = vmatpush.bf16.msra.mxu1 %v87_v34 }
  0x12   :  { %132 = vmatpush.bf16.msra.mxu2 %v95_v35 }
  0x13   :  { %8 = vsyncpa [#allocation3], 0  ;;  %v77_v52 = vpack.c.bf16 %v32_v44, %v31_v43  ;;  %v85_v53 = vpack.c.bf16 %v48_v48, %v47_v45  ;;  %v93_v54 = vpack.c.bf16 %v64_v51, %v63_v50  ;;  %v29_v55 = vld [vmem:[%s363_s1 + $0x10] sm:$0xff]  ;;  %v30_v56 = vld [vmem:[%s363_s1 + $0x18] sm:$0xff]  ;;  %s188_s29 = smov [#allocation2]   ;;  %s151_s6 = sshll.u32 %s365_s3, 4  ;;  %s152_s6 = int_to_ptr.hbm [resolvable:$true] %s151_s6 }
  0x14   :  { %107 = vmatpush.bf16.msra.mxu0 %v78_v42  ;;  %v45_v57 = vld [vmem:[%s363_s1 + $0x90] sm:$0xff]  ;;  %v46_v58 = vld [vmem:[%s363_s1 + $0x98] sm:$0xff]  ;;  %v76_v61 = vpack.c.bf16 %v30_v56, %v29_v55  ;;  %v27_v0 = vld [vmem:[%s363_s1] sm:$0xff]  ;;  %s149_s30 = sshll.u32 %s188_s29, 4  ;;  %vm142_vm0 = vcmask 58368   ;;  %s150_s30 = int_to_ptr.vmem [resolvable:$true] %s149_s30 }
  0x15   :  { %120 = vmatpush.bf16.msra.mxu1 %v86_v46  ;;  %v61_v59 = vld [vmem:[%s363_s1 + $0x110] sm:$0xff]  ;;  %v62_v60 = vld [vmem:[%s363_s1 + $0x118] sm:$0xff]  ;;  %v84_v62 = vpack.c.bf16 %v46_v58, %v45_v57  ;;  %v28_v1 = vld [vmem:[%s363_s1 + $0x8] sm:$0xff] }
  0x16   :  { %133 = vmatpush.bf16.msra.mxu2 %v94_v47  ;;  %v92_v63 = vpack.c.bf16 %v62_v60, %v61_v59  ;;  %v43_v2 = vld [vmem:[%s363_s1 + $0x80] sm:$0xff]  ;;  %v44_v3 = vld [vmem:[%s363_s1 + $0x88] sm:$0xff]  ;;  %v75_v6 = vpack.c.bf16 %v28_v1, %v27_v0  ;;  %v20_v11 = vld.sshfl [vmem:[#allocation1 + $0x10] sm:$0xff pattern:$0x73625140] }
  0x17   :  { %v59_v4 = vld [vmem:[%s363_s1 + $0x100] sm:$0xff]  ;;  %v60_v5 = vld [vmem:[%s363_s1 + $0x108] sm:$0xff]  ;;  %v83_v8 = vpack.c.bf16 %v44_v3, %v43_v2  ;;  %v26_v14 = vpack.c.bf16 %v20_v11, %v20_v11 }
  0x18   :  { %108 = vmatpush.bf16.msra.mxu0 %v77_v52  ;;  %v18_v7 = vld.sshfl [vmem:[#allocation1] sm:$0xff pattern:$0x73625140]  ;;  %v91_v9 = vpack.c.bf16 %v60_v5, %v59_v4  ;;  %v19_v10 = vld.sshfl [vmem:[#allocation1 + $0x8] sm:$0xff pattern:$0x73625140] }
  0x19   :  { %121 = vmatpush.bf16.msra.mxu1 %v85_v53  ;;  %v24_v12 = vpack.c.bf16 %v18_v7, %v18_v7  ;;  %v25_v13 = vpack.c.bf16 %v19_v10, %v19_v10  ;;  %v161_v15 = vld [vmem:[%s364_s2] ss:$0 sm:$0xff] }
  0x1a   :  { %134 = vmatpush.bf16.msra.mxu2 %v93_v54 }
  0x1c   :  { %109 = vmatpush.bf16.msra.mxu0 %v76_v61 }
  0x1d   :  { %122 = vmatpush.bf16.msra.mxu1 %v84_v62 }
  0x1e   :  { %135 = vmatpush.bf16.msra.mxu2 %v92_v63 }
  0x20   :  { %110 = vmatpush.bf16.msra.mxu0 %v75_v6 }
  0x21   :  { %123 = vmatpush.bf16.msra.mxu1 %v83_v8 }
  0x22   :  { %136 = vmatpush.bf16.msra.mxu2 %v91_v9 }
  0x23   :  { %111 = vmatmul.bf16.vlgmr.msra.gmra.mxu0 %v24_v12 }
  0x24   :  { %124 = vmatmul.bf16.vlgmr.msra.gmra.mxu1 %v25_v13 }
  0x25   :  { %137 = vmatmul.bf16.vlgmr.msra.gmra.mxu2 %v26_v14 }
  0xa0   :  { %v112_v16 = vpop.f32.mrf.mxu0 }
  0xa1   :  { %v113_v17 = vadd.f32 %v161_v15, %v112_v16  ;;  %v125_v18 = vpop.f32.mrf.mxu1 }
  0xa3   :  { %v126_v19 = vadd.f32 %v125_v18, %v113_v17 }
  0xa8   :  { %v138_v20 = vpop.f32.mrf.mxu2  ;;  %v114_v22 = vpop.f32.mrf.mxu0 }
  0xa9   :  { %v139_v21 = vadd.f32 %v138_v20, %v126_v19  ;;  %v127_v23 = vpop.f32.mrf.mxu1 }
  0xab   :  { %143 = vst.msk [vmem:[#allocation2] sm:$0x3] %vm142_vm0, %v139_v21 }
  0xac   :  { %154 = dma.vmem_to_hbm [thread:$0]  %s150_s30, 32, %s152_s6, [#allocation3]  }
  0xb0   :  { %v140_v24 = vpop.f32.mrf.mxu2 }
  0xb1   :  { %186 = dma.done.wait [#allocation3], 32  }
  0xb2   :  { %187 = vsyncadd [#allocation3], 4294967264 }
  0xb3   :  { %159 = vsyncpa [#allocation3], 1 }

</bundles_post_ra>
